<compile_context>
chip_gen: v7x
topology: tpu7x:2x2x1
jax: 0.10.0
libtpu: 0.0.40
codegen_flags: <defaults>
</compile_context>

<pallas_src>
import functools

import jax
import jax.numpy as jnp
import numpy as np
from jax.experimental import pallas as pl
from jax.experimental.pallas import tpu as pltpu


def _residual_cnn_kernel(x_ref, masks_ref, w1_ref, b1_ref, w2_ref, b2_ref,
                         o_ref, xtaps_ref, *, shifts, use_bf16_mxu):
    # x_ref    : (1, 1, L) flattened batch block (bb images on the lane axis)
    # masks_ref: (9, L)    boundary masks per 3x3 tap (resident constant)
    # w1_ref   : (Ch, 9)   conv1 weights, tap-major columns
    # b1_ref   : (Ch, 1)   conv1 bias
    # w2_ref   : (9, Ch)   conv2 weights, tap-major rows
    # b2_ref   : (1,)      conv2 bias (SMEM scalar)
    # o_ref    : (1, 1, L) output block
    # xtaps_ref: (9, L)    VMEM scratch — masked tap slab feeding the MXU
    x = x_ref[0]                                           # (1, L), lane-dense

    # ---- assemble the 9-tap slab: per tap a cheap (1, L) lane roll (XLU)
    # ---- plus mask multiply; only one tap row is live in vregs at a time.
    for t, s in enumerate(shifts):
        xt = pltpu.roll(x, shift=s, axis=1) if s else x
        xtaps_ref[t:t + 1, :] = xt * masks_ref[t:t + 1, :]

    dot_dtype = jnp.bfloat16 if use_bf16_mxu else jnp.float32
    prec = None if use_bf16_mxu else jax.lax.Precision.HIGHEST

    # ---- conv1 (1 -> Ch): tap contraction on the MXU, K = 9 ----------------
    hidden = jnp.dot(w1_ref[...].astype(dot_dtype),
                     xtaps_ref[...].astype(dot_dtype),
                     preferred_element_type=jnp.float32,
                     precision=prec)                       # (Ch, L)
    hidden = jnp.maximum(hidden + b1_ref[...], 0.0)

    # ---- conv2 (Ch -> 1): channel contraction FIRST on the MXU, then the 9
    # ---- spatial taps of the channel-reduced slab via (1, L) rolls + masks.
    g = jnp.dot(w2_ref[...].astype(dot_dtype),
                hidden.astype(dot_dtype),
                preferred_element_type=jnp.float32,
                precision=prec)                            # (9, L)

    out = x + b2_ref[0]                                    # residual + bias
    for t, s in enumerate(shifts):
        gt = g[t:t + 1, :]
        gts = pltpu.roll(gt, shift=s, axis=1) if s else gt
        out = out + masks_ref[t:t + 1, :] * gts
    o_ref[0] = out.astype(o_ref.dtype)


def _choose_batch_block(batch, hwp, ch, *, vmem_budget_bytes=8 << 20,
                        min_grid_steps=8):
    """Pick the per-step batch block size from a VMEM budget (portable across
    v5e/v6e 128 MiB and v7x 64 MiB), while keeping >= min_grid_steps steps so
    the BlockSpec pipeline can overlap DMA with compute on every core."""
    # Rough resident f32 rows of length hwp per image per step:
    #   2x double-buffered input + 2x output + 2x9 mask rows + 16 tap scratch
    #   + Ch hidden + 9 channel-reduced taps + slack.
    rows = 2 + 2 + 18 + 16 + ch + 9 + 8
    bb_vmem = max(1, vmem_budget_bytes // (rows * hwp * 4))
    bb_steps = max(1, batch // min_grid_steps)
    return int(max(1, min(bb_vmem, bb_steps, batch)))


def residual_cnn_forward(x, w1_oihw, b1, w2_oihw, b2, *, use_bf16_mxu=False):
    """x: (B, H, W) float32; weights in PyTorch OIHW layout (in_channels=1).
    Returns (B, H, W)."""
    B, H, W = x.shape
    Ch = w1_oihw.shape[0]
    HW = H * W
    HWp = -(-HW // 128) * 128                 # lane-dense (multiple of 128)

    bb = _choose_batch_block(B, HWp, Ch)
    nblk = -(-B // bb)
    Bp = nblk * bb
    L = bb * HWp                              # lanes per grid step

    # --- flatten spatial dims onto the lane axis; pad spatial & batch -------
    xf = x.astype(jnp.float32).reshape(B, HW)
    if HWp != HW:
        xf = jnp.pad(xf, ((0, 0), (0, HWp - HW)))
    if Bp != B:
        xf = jnp.pad(xf, ((0, Bp - B), (0, 0)))
    x_blk = xf.reshape(nblk, 1, L)            # bb images concatenated on lanes

    # --- 3x3 stencil: flat-lane roll shifts + boundary masks (host, once) ---
    q = np.arange(HWp)
    row, col = q // W, q % W
    in_img = q < HW
    shifts, mask_rows = [], []
    for a in (-1, 0, 1):
        for b_ in (-1, 0, 1):
            delta = a * W + b_                # tap offset in flat coords
            shifts.append(int((-delta) % L))
            valid = (in_img & (row + a >= 0) & (row + a < H)
                     & (col + b_ >= 0) & (col + b_ < W))
            mask_rows.append(valid.astype(np.float32))
    masks = jnp.asarray(np.tile(np.stack(mask_rows), (1, bb)))      # (9, L)

    # --- weights as tap-major matrices feeding the MXU ----------------------
    w1_mat = w1_oihw.astype(jnp.float32).reshape(Ch, 9)             # (Ch, 9)
    w2_mat = jnp.transpose(
        w2_oihw.astype(jnp.float32)[0].reshape(Ch, 9))              # (9, Ch)
    b1_c = b1.astype(jnp.float32).reshape(Ch, 1)
    b2_s = b2.astype(jnp.float32).reshape(1)

    kernel = functools.partial(_residual_cnn_kernel, shifts=tuple(shifts),
                               use_bf16_mxu=use_bf16_mxu)

    out = pl.pallas_call(
        kernel,
        out_shape=jax.ShapeDtypeStruct((nblk, 1, L), jnp.float32),
        grid_spec=pltpu.PrefetchScalarGridSpec(
            num_scalar_prefetch=0,
            grid=(nblk,),
            in_specs=[
                pl.BlockSpec((1, 1, L), lambda i: (i, 0, 0)),       # x block
                pl.BlockSpec((9, L), lambda i: (0, 0)),             # masks
                pl.BlockSpec((Ch, 9), lambda i: (0, 0)),            # conv1 W
                pl.BlockSpec((Ch, 1), lambda i: (0, 0)),            # conv1 b
                pl.BlockSpec((9, Ch), lambda i: (0, 0)),            # conv2 W
                pl.BlockSpec(memory_space=pltpu.MemorySpace.SMEM),  # conv2 b
            ],
            out_specs=pl.BlockSpec((1, 1, L), lambda i: (i, 0, 0)),
            scratch_shapes=[pltpu.VMEM((9, L), jnp.float32)],
        ),
        compiler_params=pltpu.CompilerParams(
            dimension_semantics=("parallel",),
            vmem_limit_bytes=32 * 1024 * 1024),
    )(x_blk, masks, w1_mat, b1_c, w2_mat, b2_s)

    return out.reshape(Bp, HWp)[:B, :HW].reshape(B, H, W)


def ref_forward(x, w1_oihw, b1, w2_oihw, b2):
    """Pure-JAX reference matching the PyTorch module semantics (exact f32)."""
    xn = x[:, None].astype(jnp.float32)       # (B, 1, H, W)
    dn = ("NCHW", "OIHW", "NCHW")
    hp = jax.lax.Precision.HIGHEST
    y = jax.lax.conv_general_dilated(xn, w1_oihw, (1, 1), "SAME",
                                     dimension_numbers=dn, precision=hp)
    y = jnp.maximum(y + b1[None, :, None, None], 0.0)
    z = jax.lax.conv_general_dilated(y, w2_oihw, (1, 1), "SAME",
                                     dimension_numbers=dn, precision=hp)
    z = z + b2[None, :, None, None]
    return (z + xn)[:, 0]


if __name__ == "__main__":
    B, H, W = 2, 16, 16
    in_channels, hidden_channels = 1, 16

    key = jax.random.PRNGKey(0)
    kx, k1, k2, k3, k4 = jax.random.split(key, 5)

    # deterministic synthetic parameters (PyTorch conv weight layout OIHW)
    w1_oihw = 0.1 * jax.random.normal(k1, (hidden_channels, in_channels, 3, 3),
                                      jnp.float32)
    b1 = 0.1 * jax.random.normal(k2, (hidden_channels,), jnp.float32)
    w2_oihw = 0.1 * jax.random.normal(k3, (in_channels, hidden_channels, 3, 3),
                                      jnp.float32)
    b2 = 0.1 * jax.random.normal(k4, (in_channels,), jnp.float32)

    x = jax.random.normal(kx, (B, H, W), jnp.float32)

    out = jax.block_until_ready(residual_cnn_forward(x, w1_oihw, b1, w2_oihw, b2))
    ref = jax.block_until_ready(ref_forward(x, w1_oihw, b1, w2_oihw, b2))

    np.testing.assert_allclose(np.asarray(out), np.asarray(ref),
                               rtol=1e-4, atol=1e-4)
    print("KERNEL_OK")
</pallas_src>

<mosaic_0001>
module attributes {stable_mosaic.version = 11 : i64} {
  func.func @_residual_cnn_kernel(%arg0: i32, %arg1: memref<1x1x256xf32, #tpu.memory_space<vmem>>, %arg2: memref<9x256xf32, #tpu.memory_space<vmem>>, %arg3: memref<16x9xf32, #tpu.memory_space<vmem>>, %arg4: memref<16x1xf32, #tpu.memory_space<vmem>>, %arg5: memref<9x16xf32, #tpu.memory_space<vmem>>, %arg6: memref<1xf32, #tpu.memory_space<smem>>, %arg7: memref<1x1x256xf32, #tpu.memory_space<vmem>>, %arg8: memref<9x256xf32, #tpu.memory_space<vmem>>) attributes {dimension_semantics = [#tpu.dimension_semantics<parallel>], iteration_bounds = array<i64: 2>, scalar_prefetch = 0 : i64, scratch_operands = 1 : i64, tpu.core_type = #tpu.core_type<tc>, window_params = [{transform_indices = @transform_0, window_bounds = array<i64: 1, 1, 256>}, {pipeline_mode = #tpu.pipeline_mode<synchronous>, transform_indices = @transform_1, window_bounds = array<i64: 9, 256>}, {pipeline_mode = #tpu.pipeline_mode<synchronous>, transform_indices = @transform_2, window_bounds = array<i64: 16, 9>}, {pipeline_mode = #tpu.pipeline_mode<synchronous>, transform_indices = @transform_3, window_bounds = array<i64: 16, 1>}, {pipeline_mode = #tpu.pipeline_mode<synchronous>, transform_indices = @transform_4, window_bounds = array<i64: 9, 16>}, {transform_indices = @transform_5, window_bounds = array<i64: 1>}, {transform_indices = @transform_6, window_bounds = array<i64: 1, 1, 256>}]} {
    %c0 = arith.constant 0 : index
    %c0_0 = arith.constant 0 : index
    %c0_1 = arith.constant 0 : index
    %0 = vector.load %arg1[%c0, %c0_0, %c0_1] : memref<1x1x256xf32, #tpu.memory_space<vmem>>, vector<1x1x256xf32>
    %1 = vector.shape_cast %0 : vector<1x1x256xf32> to vector<1x256xf32>
    %c17_i32 = arith.constant 17 : i32
    %2 = tpu.dynamic_rotate %1 by %c17_i32 dim 1 : vector<1x256xf32>, i32 -> vector<1x256xf32>
    %c0_2 = arith.constant 0 : index
    %c0_3 = arith.constant 0 : index
    %3 = vector.load %arg2[%c0_2, %c0_3] : memref<9x256xf32, #tpu.memory_space<vmem>>, vector<1x256xf32>
    %4 = arith.mulf %2, %3 : vector<1x256xf32>
    %c0_4 = arith.constant 0 : index
    %c0_5 = arith.constant 0 : index
    %5 = vector.load %arg8[%c0_4, %c0_5] : memref<9x256xf32, #tpu.memory_space<vmem>>, vector<1x256xf32>
    tpu.vector_store %arg8[%c0_4, %c0_5], %4 {strides = array<i32>} : memref<9x256xf32, #tpu.memory_space<vmem>>, vector<1x256xf32>,
    %c16_i32 = arith.constant 16 : i32
    %6 = tpu.dynamic_rotate %1 by %c16_i32 dim 1 : vector<1x256xf32>, i32 -> vector<1x256xf32>
    %c1 = arith.constant 1 : index
    %c0_6 = arith.constant 0 : index
    %7 = vector.load %arg2[%c1, %c0_6] : memref<9x256xf32, #tpu.memory_space<vmem>>, vector<1x256xf32>
    %8 = arith.mulf %6, %7 : vector<1x256xf32>
    %c1_7 = arith.constant 1 : index
    %c0_8 = arith.constant 0 : index
    %9 = vector.load %arg8[%c1_7, %c0_8] : memref<9x256xf32, #tpu.memory_space<vmem>>, vector<1x256xf32>
    tpu.vector_store %arg8[%c1_7, %c0_8], %8 {strides = array<i32>} : memref<9x256xf32, #tpu.memory_space<vmem>>, vector<1x256xf32>,
    %c15_i32 = arith.constant 15 : i32
    %10 = tpu.dynamic_rotate %1 by %c15_i32 dim 1 : vector<1x256xf32>, i32 -> vector<1x256xf32>
    %c2 = arith.constant 2 : index
    %c0_9 = arith.constant 0 : index
    %11 = vector.load %arg2[%c2, %c0_9] : memref<9x256xf32, #tpu.memory_space<vmem>>, vector<1x256xf32>
    %12 = arith.mulf %10, %11 : vector<1x256xf32>
    %c2_10 = arith.constant 2 : index
    %c0_11 = arith.constant 0 : index
    %13 = vector.load %arg8[%c2_10, %c0_11] : memref<9x256xf32, #tpu.memory_space<vmem>>, vector<1x256xf32>
    tpu.vector_store %arg8[%c2_10, %c0_11], %12 {strides = array<i32>} : memref<9x256xf32, #tpu.memory_space<vmem>>, vector<1x256xf32>,
    %c1_i32 = arith.constant 1 : i32
    %14 = tpu.dynamic_rotate %1 by %c1_i32 dim 1 : vector<1x256xf32>, i32 -> vector<1x256xf32>
    %c3 = arith.constant 3 : index
    %c0_12 = arith.constant 0 : index
    %15 = vector.load %arg2[%c3, %c0_12] : memref<9x256xf32, #tpu.memory_space<vmem>>, vector<1x256xf32>
    %16 = arith.mulf %14, %15 : vector<1x256xf32>
    %c3_13 = arith.constant 3 : index
    %c0_14 = arith.constant 0 : index
    %17 = vector.load %arg8[%c3_13, %c0_14] : memref<9x256xf32, #tpu.memory_space<vmem>>, vector<1x256xf32>
    tpu.vector_store %arg8[%c3_13, %c0_14], %16 {strides = array<i32>} : memref<9x256xf32, #tpu.memory_space<vmem>>, vector<1x256xf32>,
    %c4 = arith.constant 4 : index
    %c0_15 = arith.constant 0 : index
    %18 = vector.load %arg2[%c4, %c0_15] : memref<9x256xf32, #tpu.memory_space<vmem>>, vector<1x256xf32>
    %19 = arith.mulf %1, %18 : vector<1x256xf32>
    %c4_16 = arith.constant 4 : index
    %c0_17 = arith.constant 0 : index
    %20 = vector.load %arg8[%c4_16, %c0_17] : memref<9x256xf32, #tpu.memory_space<vmem>>, vector<1x256xf32>
    tpu.vector_store %arg8[%c4_16, %c0_17], %19 {strides = array<i32>} : memref<9x256xf32, #tpu.memory_space<vmem>>, vector<1x256xf32>,
    %c255_i32 = arith.constant 255 : i32
    %21 = tpu.dynamic_rotate %1 by %c255_i32 dim 1 : vector<1x256xf32>, i32 -> vector<1x256xf32>
    %c5 = arith.constant 5 : index
    %c0_18 = arith.constant 0 : index
    %22 = vector.load %arg2[%c5, %c0_18] : memref<9x256xf32, #tpu.memory_space<vmem>>, vector<1x256xf32>
    %23 = arith.mulf %21, %22 : vector<1x256xf32>
    %c5_19 = arith.constant 5 : index
    %c0_20 = arith.constant 0 : index
    %24 = vector.load %arg8[%c5_19, %c0_20] : memref<9x256xf32, #tpu.memory_space<vmem>>, vector<1x256xf32>
    tpu.vector_store %arg8[%c5_19, %c0_20], %23 {strides = array<i32>} : memref<9x256xf32, #tpu.memory_space<vmem>>, vector<1x256xf32>,
    %c241_i32 = arith.constant 241 : i32
    %25 = tpu.dynamic_rotate %1 by %c241_i32 dim 1 : vector<1x256xf32>, i32 -> vector<1x256xf32>
    %c6 = arith.constant 6 : index
    %c0_21 = arith.constant 0 : index
    %26 = vector.load %arg2[%c6, %c0_21] : memref<9x256xf32, #tpu.memory_space<vmem>>, vector<1x256xf32>
    %27 = arith.mulf %25, %26 : vector<1x256xf32>
    %c6_22 = arith.constant 6 : index
    %c0_23 = arith.constant 0 : index
    %28 = vector.load %arg8[%c6_22, %c0_23] : memref<9x256xf32, #tpu.memory_space<vmem>>, vector<1x256xf32>
    tpu.vector_store %arg8[%c6_22, %c0_23], %27 {strides = array<i32>} : memref<9x256xf32, #tpu.memory_space<vmem>>, vector<1x256xf32>,
    %c240_i32 = arith.constant 240 : i32
    %29 = tpu.dynamic_rotate %1 by %c240_i32 dim 1 : vector<1x256xf32>, i32 -> vector<1x256xf32>
    %c7 = arith.constant 7 : index
    %c0_24 = arith.constant 0 : index
    %30 = vector.load %arg2[%c7, %c0_24] : memref<9x256xf32, #tpu.memory_space<vmem>>, vector<1x256xf32>
    %31 = arith.mulf %29, %30 : vector<1x256xf32>
    %c7_25 = arith.constant 7 : index
    %c0_26 = arith.constant 0 : index
    %32 = vector.load %arg8[%c7_25, %c0_26] : memref<9x256xf32, #tpu.memory_space<vmem>>, vector<1x256xf32>
    tpu.vector_store %arg8[%c7_25, %c0_26], %31 {strides = array<i32>} : memref<9x256xf32, #tpu.memory_space<vmem>>, vector<1x256xf32>,
    %c239_i32 = arith.constant 239 : i32
    %33 = tpu.dynamic_rotate %1 by %c239_i32 dim 1 : vector<1x256xf32>, i32 -> vector<1x256xf32>
    %c8 = arith.constant 8 : index
    %c0_27 = arith.constant 0 : index
    %34 = vector.load %arg2[%c8, %c0_27] : memref<9x256xf32, #tpu.memory_space<vmem>>, vector<1x256xf32>
    %35 = arith.mulf %33, %34 : vector<1x256xf32>
    %c8_28 = arith.constant 8 : index
    %c0_29 = arith.constant 0 : index
    %36 = vector.load %arg8[%c8_28, %c0_29] : memref<9x256xf32, #tpu.memory_space<vmem>>, vector<1x256xf32>
    tpu.vector_store %arg8[%c8_28, %c0_29], %35 {strides = array<i32>} : memref<9x256xf32, #tpu.memory_space<vmem>>, vector<1x256xf32>,
    %c0_30 = arith.constant 0 : index
    %c0_31 = arith.constant 0 : index
    %37 = vector.load %arg3[%c0_30, %c0_31] : memref<16x9xf32, #tpu.memory_space<vmem>>, vector<16x9xf32>
    %c0_32 = arith.constant 0 : index
    %c0_33 = arith.constant 0 : index
    %38 = vector.load %arg8[%c0_32, %c0_33] : memref<9x256xf32, #tpu.memory_space<vmem>>, vector<9x256xf32>
    %cst = arith.constant dense<0.000000e+00> : vector<16x256xf32>
    %39 = tpu.matmul %37, %38, %cst {dimension_numbers = #tpu.dot_dimension_numbers<[1], [0], [0], [1], [0, 0, 1, 1], [], []>, precision = #tpu.contract_precision<fp32>} : vector<16x9xf32>, vector<9x256xf32>, vector<16x256xf32> -> vector<16x256xf32>
    %c0_34 = arith.constant 0 : index
    %c0_35 = arith.constant 0 : index
    %40 = vector.load %arg4[%c0_34, %c0_35] : memref<16x1xf32, #tpu.memory_space<vmem>>, vector<16x1xf32>
    %41 = vector.broadcast %40 : vector<16x1xf32> to vector<16x256xf32>
    %42 = arith.addf %39, %41 : vector<16x256xf32>
    %cst_36 = arith.constant 0.000000e+00 : f32
    %43 = vector.broadcast %cst_36 : f32 to vector<16x256xf32>
    %44 = arith.maximumf %42, %43 : vector<16x256xf32>
    %c0_37 = arith.constant 0 : index
    %c0_38 = arith.constant 0 : index
    %45 = vector.load %arg5[%c0_37, %c0_38] : memref<9x16xf32, #tpu.memory_space<vmem>>, vector<9x16xf32>
    %cst_39 = arith.constant dense<0.000000e+00> : vector<9x256xf32>
    %46 = tpu.matmul %45, %44, %cst_39 {dimension_numbers = #tpu.dot_dimension_numbers<[1], [0], [0], [1], [0, 0, 1, 1], [], []>, precision = #tpu.contract_precision<fp32>} : vector<9x16xf32>, vector<16x256xf32>, vector<9x256xf32> -> vector<9x256xf32>
    %c0_40 = arith.constant 0 : index
    %47 = memref.load %arg6[%c0_40] : memref<1xf32, #tpu.memory_space<smem>>
    %48 = vector.broadcast %47 : f32 to vector<1x256xf32>
    %49 = arith.addf %1, %48 : vector<1x256xf32>
    %50 = vector.extract_strided_slice %46 {offsets = [0, 0], sizes = [1, 256], strides = [1, 1]} : vector<9x256xf32> to vector<1x256xf32>
    %c17_i32_41 = arith.constant 17 : i32
    %51 = tpu.dynamic_rotate %50 by %c17_i32_41 dim 1 : vector<1x256xf32>, i32 -> vector<1x256xf32>
    %c0_42 = arith.constant 0 : index
    %c0_43 = arith.constant 0 : index
    %52 = vector.load %arg2[%c0_42, %c0_43] : memref<9x256xf32, #tpu.memory_space<vmem>>, vector<1x256xf32>
    %53 = arith.mulf %52, %51 : vector<1x256xf32>
    %54 = arith.addf %49, %53 : vector<1x256xf32>
    %55 = vector.extract_strided_slice %46 {offsets = [1, 0], sizes = [1, 256], strides = [1, 1]} : vector<9x256xf32> to vector<1x256xf32>
    %c16_i32_44 = arith.constant 16 : i32
    %56 = tpu.dynamic_rotate %55 by %c16_i32_44 dim 1 : vector<1x256xf32>, i32 -> vector<1x256xf32>
    %c1_45 = arith.constant 1 : index
    %c0_46 = arith.constant 0 : index
    %57 = vector.load %arg2[%c1_45, %c0_46] : memref<9x256xf32, #tpu.memory_space<vmem>>, vector<1x256xf32>
    %58 = arith.mulf %57, %56 : vector<1x256xf32>
    %59 = arith.addf %54, %58 : vector<1x256xf32>
    %60 = vector.extract_strided_slice %46 {offsets = [2, 0], sizes = [1, 256], strides = [1, 1]} : vector<9x256xf32> to vector<1x256xf32>
    %c15_i32_47 = arith.constant 15 : i32
    %61 = tpu.dynamic_rotate %60 by %c15_i32_47 dim 1 : vector<1x256xf32>, i32 -> vector<1x256xf32>
    %c2_48 = arith.constant 2 : index
    %c0_49 = arith.constant 0 : index
    %62 = vector.load %arg2[%c2_48, %c0_49] : memref<9x256xf32, #tpu.memory_space<vmem>>, vector<1x256xf32>
    %63 = arith.mulf %62, %61 : vector<1x256xf32>
    %64 = arith.addf %59, %63 : vector<1x256xf32>
    %65 = vector.extract_strided_slice %46 {offsets = [3, 0], sizes = [1, 256], strides = [1, 1]} : vector<9x256xf32> to vector<1x256xf32>
    %c1_i32_50 = arith.constant 1 : i32
    %66 = tpu.dynamic_rotate %65 by %c1_i32_50 dim 1 : vector<1x256xf32>, i32 -> vector<1x256xf32>
    %c3_51 = arith.constant 3 : index
    %c0_52 = arith.constant 0 : index
    %67 = vector.load %arg2[%c3_51, %c0_52] : memref<9x256xf32, #tpu.memory_space<vmem>>, vector<1x256xf32>
    %68 = arith.mulf %67, %66 : vector<1x256xf32>
    %69 = arith.addf %64, %68 : vector<1x256xf32>
    %70 = vector.extract_strided_slice %46 {offsets = [4, 0], sizes = [1, 256], strides = [1, 1]} : vector<9x256xf32> to vector<1x256xf32>
    %c4_53 = arith.constant 4 : index
    %c0_54 = arith.constant 0 : index
    %71 = vector.load %arg2[%c4_53, %c0_54] : memref<9x256xf32, #tpu.memory_space<vmem>>, vector<1x256xf32>
    %72 = arith.mulf %71, %70 : vector<1x256xf32>
    %73 = arith.addf %69, %72 : vector<1x256xf32>
    %74 = vector.extract_strided_slice %46 {offsets = [5, 0], sizes = [1, 256], strides = [1, 1]} : vector<9x256xf32> to vector<1x256xf32>
    %c255_i32_55 = arith.constant 255 : i32
    %75 = tpu.dynamic_rotate %74 by %c255_i32_55 dim 1 : vector<1x256xf32>, i32 -> vector<1x256xf32>
    %c5_56 = arith.constant 5 : index
    %c0_57 = arith.constant 0 : index
    %76 = vector.load %arg2[%c5_56, %c0_57] : memref<9x256xf32, #tpu.memory_space<vmem>>, vector<1x256xf32>
    %77 = arith.mulf %76, %75 : vector<1x256xf32>
    %78 = arith.addf %73, %77 : vector<1x256xf32>
    %79 = vector.extract_strided_slice %46 {offsets = [6, 0], sizes = [1, 256], strides = [1, 1]} : vector<9x256xf32> to vector<1x256xf32>
    %c241_i32_58 = arith.constant 241 : i32
    %80 = tpu.dynamic_rotate %79 by %c241_i32_58 dim 1 : vector<1x256xf32>, i32 -> vector<1x256xf32>
    %c6_59 = arith.constant 6 : index
    %c0_60 = arith.constant 0 : index
    %81 = vector.load %arg2[%c6_59, %c0_60] : memref<9x256xf32, #tpu.memory_space<vmem>>, vector<1x256xf32>
    %82 = arith.mulf %81, %80 : vector<1x256xf32>
    %83 = arith.addf %78, %82 : vector<1x256xf32>
    %84 = vector.extract_strided_slice %46 {offsets = [7, 0], sizes = [1, 256], strides = [1, 1]} : vector<9x256xf32> to vector<1x256xf32>
    %c240_i32_61 = arith.constant 240 : i32
    %85 = tpu.dynamic_rotate %84 by %c240_i32_61 dim 1 : vector<1x256xf32>, i32 -> vector<1x256xf32>
    %c7_62 = arith.constant 7 : index
    %c0_63 = arith.constant 0 : index
    %86 = vector.load %arg2[%c7_62, %c0_63] : memref<9x256xf32, #tpu.memory_space<vmem>>, vector<1x256xf32>
    %87 = arith.mulf %86, %85 : vector<1x256xf32>
    %88 = arith.addf %83, %87 : vector<1x256xf32>
    %89 = vector.extract_strided_slice %46 {offsets = [8, 0], sizes = [1, 256], strides = [1, 1]} : vector<9x256xf32> to vector<1x256xf32>
    %c239_i32_64 = arith.constant 239 : i32
    %90 = tpu.dynamic_rotate %89 by %c239_i32_64 dim 1 : vector<1x256xf32>, i32 -> vector<1x256xf32>
    %c8_65 = arith.constant 8 : index
    %c0_66 = arith.constant 0 : index
    %91 = vector.load %arg2[%c8_65, %c0_66] : memref<9x256xf32, #tpu.memory_space<vmem>>, vector<1x256xf32>
    %92 = arith.mulf %91, %90 : vector<1x256xf32>
    %93 = arith.addf %88, %92 : vector<1x256xf32>
    %c0_67 = arith.constant 0 : index
    %c0_68 = arith.constant 0 : index
    %c0_69 = arith.constant 0 : index
    %94 = vector.load %arg7[%c0_67, %c0_68, %c0_69] : memref<1x1x256xf32, #tpu.memory_space<vmem>>, vector<1x1x256xf32>
    %95 = vector.shape_cast %94 : vector<1x1x256xf32> to vector<1x256xf32>
    %96 = vector.shape_cast %93 : vector<1x256xf32> to vector<1x1x256xf32>
    tpu.vector_store %arg7[%c0_67, %c0_68, %c0_69], %96 {strides = array<i32>} : memref<1x1x256xf32, #tpu.memory_space<vmem>>, vector<1x1x256xf32>,
    return
  }
  func.func @transform_0(%arg0: i32) -> (i32, i32, i32) {
    %c0_i32 = arith.constant 0 : i32
    %c0_i32_0 = arith.constant 0 : i32
    %c0_i32_1 = arith.constant 0 : i32
    return %arg0, %c0_i32, %c0_i32_0 : i32, i32, i32
  }
  func.func @transform_1(%arg0: i32) -> (i32, i32) {
    %c0_i32 = arith.constant 0 : i32
    %c0_i32_0 = arith.constant 0 : i32
    %c0_i32_1 = arith.constant 0 : i32
    return %c0_i32, %c0_i32_0 : i32, i32
  }
  func.func @transform_2(%arg0: i32) -> (i32, i32) {
    %c0_i32 = arith.constant 0 : i32
    %c0_i32_0 = arith.constant 0 : i32
    %c0_i32_1 = arith.constant 0 : i32
    return %c0_i32, %c0_i32_0 : i32, i32
  }
  func.func @transform_3(%arg0: i32) -> (i32, i32) {
    %c0_i32 = arith.constant 0 : i32
    %c0_i32_0 = arith.constant 0 : i32
    %c0_i32_1 = arith.constant 0 : i32
    return %c0_i32, %c0_i32_0 : i32, i32
  }
  func.func @transform_4(%arg0: i32) -> (i32, i32) {
    %c0_i32 = arith.constant 0 : i32
    %c0_i32_0 = arith.constant 0 : i32
    %c0_i32_1 = arith.constant 0 : i32
    return %c0_i32, %c0_i32_0 : i32, i32
  }
  func.func @transform_5(%arg0: i32) -> i32 {
    %c0_i32 = arith.constant 0 : i32
    %c0_i32_0 = arith.constant 0 : i32
    return %c0_i32 : i32
  }
  func.func @transform_6(%arg0: i32) -> (i32, i32, i32) {
    %c0_i32 = arith.constant 0 : i32
    %c0_i32_0 = arith.constant 0 : i32
    %c0_i32_1 = arith.constant 0 : i32
    return %arg0, %c0_i32, %c0_i32_0 : i32, i32, i32
  }
}

</mosaic_0001>

<bundles_post_ra>
// kernel: tpu_custom_call.1
= control target key start
LH: loop header
LB: loop body
LE: loop exit
PB: predicated region body
PF: predicated region fallthrough
CT: control target
= control target key end

     0   :  { %s2991_s0 = inlined_call_operand.hbm [shape: f32[2,1,256], index: 0, kind: input, shape index: {}]   ;;  %s2992_s1 = inlined_call_operand.hbm [shape: f32[9,256], index: 1, kind: input, shape index: {}]   ;;  %s2993_s2 = inlined_call_operand.vmem [shape: f32[16,9], index: 2, kind: input, shape index: {}]   ;;  %s2994_s3 = inlined_call_operand.vmem [shape: f32[16,1], index: 3, kind: input, shape index: {}]   ;;  %s2995_s4 = inlined_call_operand.vmem [shape: f32[9,16], index: 4, kind: input, shape index: {}]   ;;  %s2996_s5 = inlined_call_operand.<no memory space> [shape: f32[1], index: 5, kind: input, shape index: {}]   ;;  %s2997_s6 = inlined_call_operand.hbm [shape: f32[2,1,256], index: 6, kind: output, shape index: {}]  }
   0x1   :  { %11 = sst [smem:[#allocation3]] %s2996_s5 }
   0x2   :  { %12 = vsyncpa [#allocation5], 0 }
   0x3   :  { %14 = vsyncpa [#allocation5 + $0x1], 0 }
   0x4   :  { %15 = vsyncpa [#allocation8], 0 }
   0x5   :  { %16 = vsyncpa [#allocation6], 0 }
   0x6   :  { %18 = vsyncpa [#allocation6 + $0x1], 0  ;;  %s2501_s23 = smov 0   ;;  %s2503_s24 = smov 0  }
   0x7   :  { %s2505_s25 = smov 0   ;;  %s2507_s26 = smov 0  }
   0x8 LB: > { %s2522_s5 = sadd.s32 4294967295, %s2445_s26   ;;  %s2135_s27 = sadd.s32 4294967294, %s2445_s26   ;;  %s2445_s26 = sphi %s2507_s26, %s3019_s26   ;;  %s2441_s25 = sphi %s2505_s25, %s3018_s25   ;;  %s2437_s24 = sphi %s2503_s24, %s3017_s24   ;;  %s2433_s23 = sphi %s2501_s23, %s3016_s23  }
   0x9   : > { %p44_p0 = scmp.ne.s32.totalorder %s2437_s24, %s2433_s23  ;;  %p2998_p1 = scmp.eq.s32.totalorder %s2522_s5, 0 }
   0xa   : > { %p179_p3 = scmp.eq.s32.totalorder %s2135_s27, 1  ;;  %p2136_p5 = scmp.ge.s32.totalorder %s2445_s26, 1 }
   0xb   : > { %p2531_p4 = por %p2998_p1, %p44_p0  ;;  %p186_p7 = scmp.lt.s32.totalorder %s2445_s26, 3 }
   0xc   : > { %p2536_p6 = por %p179_p3, %p44_p0  ;;  %s2447_s7 = smov [#allocation7]  }
   0xd   : > { %s3001_s28 = scalar_select %p2531_p4, 1, 0 }
   0xe   : > { %s3002_s29 = scalar_select %p2536_p6, 1, 0 }
   0xf   : > { %p2541_p8 = pnand %p2136_p5, %p186_p7  ;;  %s198_s8 = sshll.u32 %s2447_s7, 4  ;;  %s2545_s8 = int_to_ptr.vmem [resolvable:$true] %s198_s8 }
  0x10   : > { %s2557_s10 = sadd.s32 1, %s2445_s26   ;;  %s31_s11 = sadd.s32 1, %s2441_s25 }
  0x11   : > { %s3003_s30 = scalar_select %p2541_p8, 1, 0 }
  0x12   : > { %p2253_p9 = pneg %p2541_p8  ;;  %s28_s12 = ssub.s32 %s2445_s26, %s2557_s10 }
  0x13   : > { %s2317_s15 = scalar_lea.hbm %s2992_s1, 512 }
  0x14   : > { %p2552_p11 = pnand %p2253_p9, %p2998_p1  ;;  %p2318_p12 = scmp.ne.s32.totalorder %s2992_s1, %s2317_s15 }
  0x15   : > { %p2324_p5 = scmp.lt.u32.totalorder %s2317_s15, %s2992_s1 }
  0x16   : > { %p2319_p13 = pneg %p2552_p11 }
  0x18   : > { %p2320_p0 = pnand %p2319_p13, %p2318_p12 }
  0x1a   : > { %p2321_p3 = pneg %p2320_p0 }
  0x1c   : > { %p2326_p7 = pnand %p2324_p5, %p2321_p3 }
  0x1e   : > { %2329 = shalt.err (!%p2326_p7)
}
  0x1f   : > { %s2330_s20 = scalar_lea.vmem %s2545_s8, 512  ;;  %p2338_p2 = scmp.lt.s32.totalorder %s2545_s8, %s2545_s8 }
  0x20   : > { %p2331_p9 = scmp.ne.s32.totalorder %s2545_s8, %s2330_s20  ;;  %p2339_p6 = scmp.lt.s32.totalorder %s2330_s20, %s2330_s20 }
  0x22   : > { %p2333_p10 = pnand %p2331_p9, %p2319_p13  ;;  %p2340_p4 = por %p2339_p6, %p2338_p2 }
  0x24   : > { %p2334_p1 = pneg %p2333_p10 }
  0x26   : > { %p2341_p8 = pnand %p2340_p4, %p2334_p1 }
  0x28   : > { %2344 = shalt.err (!%p2341_p8)
}
  0x29   : > { %s2448_s21 = smov 256   ;;  %s2449_s22 = smov 16  }
  0x2a   : > { %2256 = dma.hbm_to_vmem [thread:$0]  (!%p2552_p11), %s2992_s1, 512, %s2545_s8, [#allocation8], %s2448_s21, %s2448_s21, %s2449_s22  }
  0x2b   : > { %p29_p2 = scmp.eq.s32.totalorder %s28_s12, 0  ;;  %p38_p1 = scmp.ne.s32.totalorder %s2441_s25, %s2437_s24 }
  0x2c   : > { %p39_p4 = scmp.eq.s32.totalorder %s2445_s26, 0  ;;  %p2266_p6 = scmp.lt.s32.totalorder %s2445_s26, 2 }
  0x2d   : > { %s2588_s13 = scalar_select %p29_p2, %s2441_s25, %s31_s11  }
  0x2e   : > { %p40_p8 = por %p39_p4, %p38_p1  ;;  %p3005_p10 = scmp.eq.s32.totalorder %s2522_s5, 1 }
  0x2f   : > { %s224_s15 = sand.u32 1, %s2441_s25   ;;  %s2151_s16 = sshll.u32 %s2445_s26, 5 }
  0x30   : > { %p2592_p12 = por %p3005_p10, %p38_p1  ;;  %s2139_s17 = sshll.u32 %s224_s15, 1 }
  0x31   : > { %s2601_s19 = scalar_lea.hbm %s2991_s0, %s2151_s16  ;;  %s228_s8 = scalar_lea.vmem [#allocation4], %s2139_s17 }
  0x32   : > { %s236_s11 = sshll.u32 %s228_s8, 4  ;;  %p2603_p11 = pnand %p2266_p6, %p40_p8  ;;  %s2607_s11 = int_to_ptr.vmem [resolvable:$true] %s236_s11 }
  0x33   : > { %s225_s20 = scalar_lea.sflag [#allocation5], %s224_s15  ;;  %s2345_s21 = scalar_lea.hbm %s2601_s19, 32 }
  0x34   : > { %p2346_p13 = scmp.ne.s32.totalorder %s2601_s19, %s2345_s21  ;;  %p2347_p0 = pneg %p2603_p11 }
  0x35   : > { %s2350_s7 = scalar_lea.hbm %s2991_s0, 64  ;;  %p2351_p7 = scmp.lt.u32.totalorder %s2601_s19, %s2991_s0 }
  0x36   : > { %p2348_p3 = pnand %p2347_p0, %p2346_p13  ;;  %p2352_p9 = scmp.lt.u32.totalorder %s2350_s7, %s2345_s21 }
  0x37   : > { %p2354_p1 = scmp.lt.u32.totalorder %s2345_s21, %s2601_s19 }
  0x38   : > { %p2349_p5 = pneg %p2348_p3  ;;  %p2353_p2 = por %p2352_p9, %p2351_p7 }
  0x3a   : > { %p2355_p4 = por %p2354_p1, %p2353_p2 }
  0x3c   : > { %p2356_p6 = pnand %p2355_p4, %p2349_p5 }
  0x3e   : > { %2359 = shalt.err (!%p2356_p6)
}
  0x3f   : > { %s2360_s15 = scalar_lea.vmem %s2607_s11, 32  ;;  %s2450_s9 = smov [#allocation4]  }
  0x40   : > { %p2361_p8 = scmp.ne.s32.totalorder %s2607_s11, %s2360_s15  ;;  %s2365_s18 = sshll.u32 %s2450_s9, 4  ;;  %s2366_s18 = int_to_ptr.vmem [resolvable:$false] %s2365_s18 }
  0x41   : > { %s2367_s8 = scalar_lea.vmem %s2366_s18, 64  ;;  %p2368_p3 = scmp.lt.s32.totalorder %s2607_s11, %s2366_s18 }
  0x42   : > { %p2363_p10 = pnand %p2361_p8, %p2347_p0  ;;  %p2369_p7 = scmp.lt.s32.totalorder %s2367_s8, %s2360_s15 }
  0x44   : > { %p2364_p13 = pneg %p2363_p10  ;;  %p2370_p9 = por %p2369_p7, %p2368_p3 }
  0x46   : > { %p2371_p2 = pnand %p2370_p9, %p2364_p13 }
  0x48   : > { %2374 = shalt.err (!%p2371_p2)
}
  0x49   : > { %2260 = dma.hbm_to_vmem [thread:$0]  (!%p2603_p11), %s2601_s19, 32, %s2607_s11, %s225_s20  }
  0x4a   : > { %p3008_p5 = scmp.ne.s32.totalorder %s3003_s30, 0 }
  0x4b   : > { %s2637_s21 = sand.u32 (!%p3008_p5), 1, %s2437_s24   ;;  %p3009_p0 = scmp.ne.s32.totalorder (!%p3008_p5), %s3001_s28, 0 }
  0x4c   : > { %245 = sbr.rel (%p3008_p5) target bundleno = 953 (0x3b9), region = 44  ;;  %s2143_s22 = sshll.u32 (!%p3008_p5), %s2637_s21, 1 }
  0x4d   : > { %s248_s27 = scalar_lea.sflag (!%p3008_p5), [#allocation5], %s2637_s21  ;;  %s251_s7 = scalar_lea.vmem (!%p3008_p5), [#allocation4], %s2143_s22 }
  0x53   : > { %2420 = dma.done.wait (%p3009_p0), %s248_s27, 32  }
  0x54   : > { %2422 = vsyncadd (%p3009_p0), %s248_s27, 4294967264  ;;  %p3010_p11 = scmp.eq.s32.totalorder %s2522_s5, 0 }
  0x56   : > { %2424 = dma.done.wait (%p3010_p11), [#allocation8], 512   ;;  %p3011_p1 = pmov %p3010_p11 }
  0x57   : > { %v286_v0 = vlaneseq  ;;  %v2655_v4 = vld [vmem:[%s251_s7] sm:$0x3]  ;;  %v473_v5 = vld [vmem:[#allocation7 + $0x4] ss:$8 sm:$0x3]  ;;  %s2451_s28 = smov 17  }
  0x58   : > { %2426 = vsyncadd (%p3011_p1), [#allocation8], 4294966784  ;;  %v474_v7 = vmul.f32 %v473_v5, %v2655_v4  ;;  %s2452_s30 = smov 111   ;;  %s2453_s19 = smov 16   ;;  %v2459_v10 = vmov 0.0   ;;  %v656_v11 = vld [vmem:[%s2994_s3] sm:$0xff] }
  0x59   : > { %v287_v1 = vshrl.u32 %v286_v0, 7  ;;  %vm2660_vm0 = vcmp.lt.s32.totalorder %v286_v0, 256  ;;  %s2454_s11 = smov 15   ;;  %s2455_s12 = smov 1   ;;  %750 = vmatprep.mubr.f32.mxu0 %v2459_v10  ;;  %1303 = vmatprep.mubr.f32.mxu1 %v2459_v10  ;;  %v657_v12 = vld [vmem:[%s2994_s3 + $0x8] sm:$0xff]  ;;  %v2460_v13 = vmov 0  }
  0x5a   : > { %476 = vst.msk [vmem:[#allocation2 + $0x4] ss:$8 sm:$0x3] %vm2660_vm0, %v474_v7  ;;  %s2456_s20 = smov 127   ;;  %s2457_s16 = smov 113   ;;  %2315 = vset.pattern.permute.xlu0 %v2460_v13  ;;  %2316 = vset.pattern.permute.xlu1 %v2460_v13  ;;  %v2692_v16 = vand.u32 127, %v286_v0 }
  0x5b   : > { %v2651_v2 = vsub.s32 0, %v287_v1  ;;  %v2653_v3 = vsub.s32 1, %v287_v1  ;;  %s2458_s17 = smov 112   ;;  %v2461_v14 = vmov 1966171168   ;;  %vm668_vm9 = vcmask 72704  }
  0x5c   : > { %v323_v15 = vunpack.c.l.s4 %v2461_v14  ;;  %v305_v17 = vld [vmem:[#allocation7] ss:$8 sm:$0x3]  ;;  %v615_v18 = vld [vmem:[#allocation7 + $0x10] ss:$8 sm:$0x3] }
  0x5d   : > { %v289_v6 = vrot.slane %v2655_v4, %v2651_v2  ;;  %v293_v9 = vrot.slane %v2655_v4, %v2653_v3  ;;  %vm302_vm1 = vcmp.lt.s32.totalorder %v2692_v16, 17  ;;  %vm611_vm2 = vcmp.lt.s32.totalorder %v2692_v16, 111  ;;  %v351_v22 = vld [vmem:[#allocation7 + $0x1] ss:$8 sm:$0x3] }
  0x5e   : > { %v324_v19 = vunpack.c.0.s8 %v323_v15  ;;  %v310_v23 = vrot.slane %v305_v17, %v2651_v2  ;;  %v314_v24 = vrot.slane %v305_v17, %v2653_v3  ;;  %v620_v25 = vrot.slane %v615_v18, %v2651_v2  ;;  %v394_v40 = vld [vmem:[#allocation7 + $0x2] ss:$8 sm:$0x3]  ;;  %v437_v53 = vld [vmem:[#allocation7 + $0x3] ss:$8 sm:$0x3] }
  0x5f   : > { %296 = vrot.lane.b32.xlu1 %v289_v6, %s2451_s28  ;;  %607 = vrot.lane.b32.xlu0 %v289_v6, %s2452_s30  ;;  %v624_v26 = vrot.slane %v615_v18, %v2653_v3  ;;  %vm347_vm3 = vcmp.lt.s32.totalorder %v2692_v16, 16  ;;  %v356_v30 = vrot.slane %v351_v22, %v2651_v2  ;;  %v360_v31 = vrot.slane %v351_v22, %v2653_v3  ;;  %v486_v5 = vld [vmem:[#allocation7 + $0x5] ss:$8 sm:$0x3] }
  0x60   : > { %v2700_v27 = vsub.s32 %v324_v19, %v287_v1  ;;  %vm390_vm4 = vcmp.lt.s32.totalorder %v2692_v16, 15  ;;  %v399_v47 = vrot.slane %v394_v40, %v2651_v2  ;;  %v403_v48 = vrot.slane %v394_v40, %v2653_v3 }
  0x61   : > { %vm433_vm5 = vcmp.lt.s32.totalorder %v2692_v16, 1  ;;  %v442_v61 = vrot.slane %v437_v53, %v2651_v2  ;;  %v446_v1 = vrot.slane %v437_v53, %v2653_v3  ;;  %vm482_vm6 = vcmp.lt.s32.totalorder %v2692_v16, 127 }
  0x62   : > { %v491_v14 = vrot.slane %v486_v5, %v2651_v2  ;;  %v495_v19 = vrot.slane %v486_v5, %v2653_v3  ;;  %vm525_vm7 = vcmp.lt.s32.totalorder %v2692_v16, 113  ;;  %vm568_vm8 = vcmp.lt.s32.totalorder %v2692_v16, 112 }
  0x63   : > { %298 = vrot.lane.b32.xlu1 %v293_v9, %s2451_s28  ;;  %609 = vrot.lane.b32.xlu0 %v293_v9, %s2452_s30  ;;  %vm675_vm10 = vcmask 1040384   ;;  %vm1228_vm11 = vcmask 130048  }
  0x67   : > { %345 = vrot.lane.b32.xlu1 %v293_v9, %s2453_s19  ;;  %343 = vrot.lane.b32.xlu0 %v289_v6, %s2453_s19 }
  0x6b   : > { %388 = vrot.lane.b32.xlu1 %v293_v9, %s2454_s11  ;;  %386 = vrot.lane.b32.xlu0 %v289_v6, %s2454_s11 }
  0x6f   : > { %431 = vrot.lane.b32.xlu1 %v293_v9, %s2455_s12  ;;  %429 = vrot.lane.b32.xlu0 %v289_v6, %s2455_s12 }
  0x73   : > { %480 = vrot.lane.b32.xlu1 %v293_v9, %s2456_s20  ;;  %478 = vrot.lane.b32.xlu0 %v289_v6, %s2456_s20 }
  0x77   : > { %523 = vrot.lane.b32.xlu1 %v293_v9, %s2457_s16  ;;  %521 = vrot.lane.b32.xlu0 %v289_v6, %s2457_s16 }
  0x7b   : > { %566 = vrot.lane.b32.xlu1 %v293_v9, %s2458_s17  ;;  %564 = vrot.lane.b32.xlu0 %v289_v6, %s2458_s17 }
  0x7f   : > { %660 = vperm.xlu0 %2315, %v656_v11   ;;  %665 = vperm.xlu1 %2316, %v657_v12  }
  0xd1   : > { %v297_v20 = vpop.permute.xlu1 %296  ;;  %v608_v21 = vpop.permute.xlu0 %607 }
  0xd5   : > { %v299_v28 = vpop.permute.xlu1 %298  ;;  %v610_v29 = vpop.permute.xlu0 %609 }
  0xd6   : > { %v303_v32 = vsel %vm302_vm1, %v297_v20, %v299_v28  ;;  %v304_v33 = vsel %vm302_vm1, %v299_v28, %v297_v20  ;;  %v612_v34 = vsel %vm611_vm2, %v608_v21, %v610_v29  ;;  %v613_v35 = vsel %vm611_vm2, %v610_v29, %v608_v21  ;;  %v529_v20 = vld [vmem:[#allocation7 + $0x6] ss:$8 sm:$0x3] }
  0xd7   : > { %v317_v36 = vmul.f32 %v310_v23, %v304_v33  ;;  %v318_v37 = vmul.f32 %v314_v24, %v303_v32  ;;  %v627_v38 = vmul.f32 %v620_v25, %v612_v34  ;;  %v628_v39 = vmul.f32 %v624_v26, %v613_v35  ;;  %v572_v33 = vld [vmem:[#allocation7 + $0x7] ss:$8 sm:$0x3] }
  0xd8   : > { %v534_v28 = vrot.slane %v529_v20, %v2651_v2  ;;  %v538_v32 = vrot.slane %v529_v20, %v2653_v3  ;;  %v577_v40 = vrot.slane %v572_v33, %v2651_v2 }
  0xd9   : > { %v321_v41 = vcombine.low %v317_v36, %v318_v37  ;;  %v631_v42 = vcombine.low %v627_v38, %v628_v39  ;;  %v346_v43 = vpop.permute.xlu1 %345  ;;  %v344_v44 = vpop.permute.xlu0 %343 }
  0xda   : > { %v348_v45 = vsel %vm347_vm3, %v344_v44, %v346_v43  ;;  %v349_v46 = vsel %vm347_vm3, %v346_v43, %v344_v44  ;;  %v581_v44 = vrot.slane %v572_v33, %v2653_v3 }
  0xdb   : > { %v328_v49 = vrot.slane %v321_v41, %v2700_v27  ;;  %v638_v50 = vrot.slane %v631_v42, %v2700_v27  ;;  %v363_v51 = vmul.f32 %v356_v30, %v349_v46  ;;  %v364_v52 = vmul.f32 %v360_v31, %v348_v45  ;;  %v650_v45 = vld [vmem:[%s2993_s2] sm:$0xff] }
  0xdc   : > { %v670_v53 = vsel %vm668_vm9, %v650_v45, 0 }
  0xdd   : > { %v335_v54 = vrot.slane %v328_v49, %v2700_v27  ;;  %v645_v55 = vrot.slane %v638_v50, %v2700_v27  ;;  %v367_v56 = vcombine.low %v363_v51, %v364_v52  ;;  %v389_v57 = vpop.permute.xlu1 %388  ;;  %v387_v58 = vpop.permute.xlu0 %386 }
  0xde   : > { %v391_v59 = vsel %vm390_vm4, %v387_v58, %v389_v57  ;;  %v392_v60 = vsel %vm390_vm4, %v389_v57, %v387_v58 }
  0xdf   : > { %341 = vst.msk [vmem:[#allocation2] ss:$8 sm:$0x3] %vm2660_vm0, %v335_v54  ;;  %648 = vst.msk [vmem:[#allocation2 + $0x10] ss:$8 sm:$0x3] %vm2660_vm0, %v645_v55  ;;  %v374_v62 = vrot.slane %v367_v56, %v2700_v27  ;;  %v406_v63 = vmul.f32 %v399_v47, %v392_v60  ;;  %v407_v0 = vmul.f32 %v403_v48, %v391_v59 }
  0xe0   : > { %v651_v54 = vld [vmem:[%s2993_s2 + $0x8] sm:$0xff]  ;;  %v2785_v59 = vand.u32 4294901760, %v670_v53 }
  0xe1   : > { %v381_v6 = vrot.slane %v374_v62, %v2700_v27  ;;  %v410_v7 = vcombine.low %v406_v63, %v407_v0  ;;  %v432_v9 = vpop.permute.xlu1 %431  ;;  %v430_v11 = vpop.permute.xlu0 %429 }
  0xe2   : > { %v434_v12 = vsel %vm433_vm5, %v430_v11, %v432_v9  ;;  %v435_v13 = vsel %vm433_vm5, %v432_v9, %v430_v11 }
  0xe3   : > { %384 = vst.msk [vmem:[#allocation2 + $0x1] ss:$8 sm:$0x3] %vm2660_vm0, %v381_v6  ;;  %v417_v15 = vrot.slane %v410_v7, %v2700_v27  ;;  %v449_v17 = vmul.f32 %v442_v61, %v435_v13  ;;  %v450_v18 = vmul.f32 %v446_v1, %v434_v12  ;;  %v673_v61 = vsel %vm668_vm9, %v651_v54, 0 }
  0xe4   : > { %v752_v1 = vsub.f32 %v670_v53, %v2785_v59  ;;  %v2793_v5 = vand.u32 4294901760, %v673_v61 }
  0xe5   : > { %v424_v21 = vrot.slane %v417_v15, %v2700_v27  ;;  %v453_v22 = vcombine.low %v449_v17, %v450_v18  ;;  %v481_v23 = vpop.permute.xlu1 %480  ;;  %v479_v24 = vpop.permute.xlu0 %478 }
  0xe6   : > { %v483_v25 = vsel %vm482_vm6, %v479_v24, %v481_v23  ;;  %v484_v26 = vsel %vm482_vm6, %v481_v23, %v479_v24  ;;  %v655_v57 = vld [vmem:[#allocation2 + $0x18] sm:$0x1]  ;;  %v654_v58 = vld [vmem:[#allocation2 + $0x10] sm:$0x1]  ;;  %v753_v9 = vand.u32 4294901760, %v752_v1  ;;  %v763_v11 = vsub.f32 %v673_v61, %v2793_v5 }
  0xe7   : > { %427 = vst.msk [vmem:[#allocation2 + $0x2] ss:$8 sm:$0x3] %vm2660_vm0, %v424_v21  ;;  %v460_v29 = vrot.slane %v453_v22, %v2700_v27  ;;  %v498_v30 = vmul.f32 %v491_v14, %v483_v25  ;;  %v499_v31 = vmul.f32 %v495_v19, %v484_v26  ;;  %v680_v62 = vsel %vm675_vm10, %v655_v57, 0 }
  0xe8   : > { %v677_v63 = vsel %vm675_vm10, %v654_v58, 0  ;;  %v686_v6 = vand.u32 4294901760, %v680_v62  ;;  %v754_v17 = vsub.f32 %v752_v1, %v753_v9  ;;  %v764_v18 = vand.u32 4294901760, %v763_v11 }
  0xe9   : > { %v467_v34 = vrot.slane %v460_v29, %v2700_v27  ;;  %v502_v35 = vcombine.low %v498_v30, %v499_v31  ;;  %v524_v36 = vpop.permute.xlu1 %523  ;;  %v522_v37 = vpop.permute.xlu0 %521  ;;  %v688_v7 = vand.u32 4294901760, %v677_v63 }
  0xea   : > { %v526_v38 = vsel %vm525_vm7, %v522_v37, %v524_v36  ;;  %v527_v39 = vsel %vm525_vm7, %v524_v36, %v522_v37  ;;  %v786_v12 = vsub.f32 %v680_v62, %v686_v6  ;;  %v765_v29 = vsub.f32 %v763_v11, %v764_v18 }
  0xeb   : > { %470 = vst.msk [vmem:[#allocation2 + $0x3] ss:$8 sm:$0x3] %vm2660_vm0, %v467_v34  ;;  %v509_v41 = vrot.slane %v502_v35, %v2700_v27  ;;  %v541_v42 = vmul.f32 %v534_v28, %v526_v38  ;;  %v542_v43 = vmul.f32 %v538_v32, %v527_v39  ;;  %v792_v13 = vsub.f32 %v677_v63, %v688_v7 }
  0xec   : > { %v787_v21 = vand.u32 4294901760, %v786_v12  ;;  %v755_v28 = vand.u32 4294901760, %v754_v17  ;;  %v766_v36 = vand.u32 4294901760, %v765_v29 }
  0xed   : > { %v516_v46 = vrot.slane %v509_v41, %v2700_v27  ;;  %v545_v47 = vcombine.low %v541_v42, %v542_v43  ;;  %v567_v48 = vpop.permute.xlu1 %566  ;;  %v565_v49 = vpop.permute.xlu0 %564  ;;  %v793_v22 = vand.u32 4294901760, %v792_v13 }
  0xee   : > { %v569_v2 = vsel %vm568_vm8, %v565_v49, %v567_v48  ;;  %v570_v50 = vsel %vm568_vm8, %v567_v48, %v565_v49  ;;  %v788_v31 = vsub.f32 %v786_v12, %v787_v21  ;;  %v1227_v49 = vld [vmem:[%s2995_s4 + $0x8] sm:$0x1] }
  0xef   : > { %519 = vst.msk [vmem:[#allocation2 + $0x5] ss:$8 sm:$0x3] %vm2660_vm0, %v516_v46  ;;  %v552_v3 = vrot.slane %v545_v47, %v2700_v27  ;;  %v584_v51 = vmul.f32 %v577_v40, %v569_v2  ;;  %v585_v52 = vmul.f32 %v581_v44, %v570_v50  ;;  %v794_v33 = vsub.f32 %v792_v13, %v793_v22  ;;  %v1226_v47 = vld [vmem:[%s2995_s4] sm:$0xff] }
  0xf0   : > { %v789_v38 = vand.u32 4294901760, %v788_v31  ;;  %v1230_v48 = vsel %vm1228_vm11, %v1226_v47, 0 }
  0xf1   : > { %v559_v55 = vrot.slane %v552_v3, %v2700_v27  ;;  %v588_v56 = vcombine.low %v584_v51, %v585_v52  ;;  %v795_v40 = vand.u32 4294901760, %v794_v33  ;;  %v2821_v2 = vand.u32 4294901760, %v1230_v48 }
  0xf2   : > { %v1233_v3 = vsel %vm1228_vm11, %v1227_v49, 0 }
  0xf3   : > { %562 = vst.msk [vmem:[#allocation2 + $0x6] ss:$8 sm:$0x3] %vm2660_vm0, %v559_v55  ;;  %v595_v60 = vrot.slane %v588_v56, %v2700_v27  ;;  %v2824_v54 = vsub.f32 %v1230_v48, %v2821_v2  ;;  %v2826_v57 = vand.u32 4294901760, %v1233_v3 }
  0xf5   : > { %v602_v0 = vrot.slane %v595_v60, %v2700_v27 }
  0xf7   : > { %605 = vst.msk [vmem:[#allocation2 + $0x7] ss:$8 sm:$0x3] %vm2660_vm0, %v602_v0  ;;  %v1306_v0 = vand.u32 4294901760, %v2824_v54 }
  0xfe   : > { %v653_v14 = vld [vmem:[#allocation2 + $0x8] sm:$0xff]  ;;  %v652_v15 = vld [vmem:[#allocation2] sm:$0xff]  ;;  %v661_v50 = vpop.permute.xlu0 %660  ;;  %v666_v56 = vpop.permute.xlu1 %665 }
  0xff   : > { %v682_v19 = vand.u32 4294901760, %v653_v14  ;;  %v684_v20 = vand.u32 4294901760, %v652_v15 }
 0x101   : > { %v2153_v23 = vpack.c.bf16 %v686_v6, %v682_v19  ;;  %v774_v24 = vsub.f32 %v653_v14, %v682_v19  ;;  %v2155_v25 = vpack.c.bf16 %v688_v7, %v684_v20  ;;  %v780_v26 = vsub.f32 %v652_v15, %v684_v20 }
 0x102   : > { %v1316_v6 = vsub.f32 %v1233_v3, %v2826_v57  ;;  %v1307_v15 = vsub.f32 %v2824_v54, %v1306_v0 }
 0x103   : > { %2154 = vmatprep.subr.bf16.mxu0 %v2153_v23  ;;  %v775_v30 = vand.u32 4294901760, %v774_v24  ;;  %v781_v32 = vand.u32 4294901760, %v780_v26  ;;  %v2161_v43 = vpack.c.bf16 %v786_v12, %v774_v24  ;;  %v2163_v44 = vpack.c.bf16 %v792_v13, %v780_v26 }
 0x104   : > { %2156 = vmatpush1.bf16.msra.mxu0 %v2155_v25  ;;  %v1317_v19 = vand.u32 4294901760, %v1316_v6 }
 0x105   : > { %v776_v34 = vsub.f32 %v774_v24, %v775_v30  ;;  %v782_v35 = vsub.f32 %v780_v26, %v781_v32  ;;  %v2169_v45 = vpack.c.bf16 %v787_v21, %v775_v30  ;;  %v2171_v46 = vpack.c.bf16 %v793_v22, %v781_v32 }
 0x106   : > { %v1308_v26 = vand.u32 4294901760, %v1307_v15  ;;  %v1318_v30 = vsub.f32 %v1316_v6, %v1317_v19 }
 0x107   : > { %756 = vmatmul.mubr.f32.vlgmr.msra.gmra.mrb[0].mxu0 %v755_v28  ;;  %v777_v37 = vand.u32 4294901760, %v776_v34  ;;  %v783_v39 = vand.u32 4294901760, %v782_v35 }
 0x108   : > { %761 = vmatprep.mubr.f32.mxu0 %v2459_v10 }
 0x109   : > { %v2157_v41 = vpack.c.bf16 %v789_v38, %v777_v37  ;;  %v2159_v42 = vpack.c.bf16 %v795_v40, %v783_v39  ;;  %v1319_v39 = vand.u32 4294901760, %v1318_v30 }
 0x10b   : > { %767 = vmatmul.mubr.f32.gmra.mrb[2].mxu0 %v766_v36  ;;  %2158 = vmatprep.subr.bf16.mxu0 %v2157_v41 }
 0x10c   : > { %2160 = vmatpush1.bf16.msra.mxu0 %v2159_v42  ;;  %857 = vmatprep.mubr.f32.mxu0 %v2459_v10 }
 0x10d   : > { %2162 = vmatprep.subr.bf16.mxu0 %v2161_v43 }
 0x10f   : > { %859 = vmatmul.mubr.f32.vlgmr.msra.gmra.mrb[0].mxu0 %v2785_v59 }
 0x110   : > { %2164 = vmatpush1.bf16.msra.mxu0 %v2163_v44  ;;  %864 = vmatprep.mubr.f32.mxu0 %v2459_v10 }
 0x111   : > { %2166 = vmatprep.subr.bf16.mxu0 %v2153_v23 }
 0x113   : > { %866 = vmatmul.mubr.f32.gmra.mrb[2].mxu0 %v2793_v5 }
 0x114   : > { %944 = vmatprep.mubr.f32.mxu0 %v2459_v10 }
 0x117   : > { %947 = vmatmul.mubr.f32.vlgmr.msra.gmra.mrb[0].mxu0 %v752_v1 }
 0x118   : > { %2168 = vmatpush1.bf16.msra.mxu0 %v2155_v25  ;;  %952 = vmatprep.mubr.f32.mxu0 %v2459_v10 }
 0x119   : > { %2170 = vmatprep.subr.bf16.mxu0 %v2169_v45 }
 0x11b   : > { %955 = vmatmul.mubr.f32.gmra.mrb[2].mxu0 %v763_v11 }
 0x11c   : > { %1029 = vmatprep.mubr.f32.mxu0 %v2459_v10 }
 0x11f   : > { %1033 = vmatmul.mubr.f32.vlgmr.msra.gmra.mrb[0].mxu0 %v753_v9 }
 0x120   : > { %2172 = vmatpush1.bf16.msra.mxu0 %v2171_v46  ;;  %1038 = vmatprep.mubr.f32.mxu0 %v2459_v10 }
 0x121   : > { %2174 = vmatprep.subr.bf16.mxu0 %v2153_v23 }
 0x123   : > { %1042 = vmatmul.mubr.f32.gmra.mrb[2].mxu0 %v764_v18 }
 0x124   : > { %1124 = vmatprep.mubr.f32.mxu0 %v2459_v10 }
 0x127   : > { %1126 = vmatmul.mubr.f32.vlgmr.msra.gmra.mrb[0].mxu0 %v2785_v59 }
 0x128   : > { %2176 = vmatpush1.bf16.msra.mxu0 %v2155_v25  ;;  %1131 = vmatprep.mubr.f32.mxu0 %v2459_v10 }
 0x12b   : > { %1133 = vmatmul.mubr.f32.gmra.mrb[2].mxu0 %v2793_v5 }
 0x12c   : > { %1207 = vmatprep.mubr.f32.mxu0 %v2459_v10 }
 0x12f   : > { %1209 = vmatmul.mubr.f32.vlgmr.msra.gmra.mrb[0].mxu0 %v2785_v59 }
 0x130   : > { %1214 = vmatprep.mubr.f32.mxu0 %v2459_v10 }
 0x133   : > { %1216 = vmatmul.mubr.f32.gmra.mrb[2].mxu0 %v2793_v5 }
 0x202   : > { %v1210_v51 = vpop.f32.mrb[0].mxu0 }
 0x203   : > { %v2201_v52 = vadd.f32 %v1210_v51, %v661_v50  ;;  %v1212_v53 = vpop.f32.mrb[1].mxu0 }
 0x204   : > { %v2202_v55 = vadd.f32 %v1212_v53, %v661_v50 }
 0x205   : > { %v1222_v58 = vmax.f32 %v2201_v52, 0.0 }
 0x206   : > { %v1223_v59 = vmax.f32 %v2202_v55, 0.0  ;;  %v1217_v60 = vpop.f32.mrb[2].mxu0 }
 0x207   : > { %v1237_v61 = vand.u32 4294901760, %v1222_v58  ;;  %v2203_v62 = vadd.f32 %v1217_v60, %v666_v56  ;;  %v1219_v63 = vpop.f32.mrb[3].mxu0 }
 0x208   : > { %v1235_v1 = vand.u32 4294901760, %v1223_v59  ;;  %v2204_v5 = vadd.f32 %v1219_v63, %v666_v56 }
 0x209   : > { %v1333_v7 = vsub.f32 %v1222_v58, %v1237_v61  ;;  %v1224_v9 = vmax.f32 %v2203_v62, 0.0 }
 0x20a   : > { %v1327_v11 = vsub.f32 %v1223_v59, %v1235_v1  ;;  %v1225_v12 = vmax.f32 %v2204_v5, 0.0 }
 0x20b   : > { %v1334_v13 = vand.u32 4294901760, %v1333_v7  ;;  %v1241_v14 = vand.u32 4294901760, %v1224_v9 }
 0x20c   : > { %v1328_v17 = vand.u32 4294901760, %v1327_v11  ;;  %v1239_v18 = vand.u32 4294901760, %v1225_v12 }
 0x20d   : > { %v1345_v20 = vsub.f32 %v1224_v9, %v1241_v14  ;;  %v2179_v21 = vpack.c.bf16 %v1241_v14, %v1237_v61  ;;  %v1335_v24 = vsub.f32 %v1333_v7, %v1334_v13 }
 0x20e   : > { %v1339_v22 = vsub.f32 %v1225_v12, %v1239_v18  ;;  %v2177_v23 = vpack.c.bf16 %v1239_v18, %v1235_v1  ;;  %v1329_v31 = vsub.f32 %v1327_v11, %v1328_v17 }
 0x20f   : > { %v1346_v25 = vand.u32 4294901760, %v1345_v20  ;;  %v2187_v28 = vpack.c.bf16 %v1345_v20, %v1333_v7  ;;  %v1336_v37 = vand.u32 4294901760, %v1335_v24  ;;  %v1817_v24 = vld [vmem:[#allocation7 + $0x1] ss:$8 sm:$0x3] }
 0x210   : > { %v1340_v29 = vand.u32 4294901760, %v1339_v22  ;;  %2178 = vmatprep.subr.bf16.mxu1 %v2177_v23  ;;  %v2185_v32 = vpack.c.bf16 %v1339_v22, %v1327_v11  ;;  %v1330_v40 = vand.u32 4294901760, %v1329_v31 }
 0x211   : > { %v1347_v33 = vsub.f32 %v1345_v20, %v1346_v25  ;;  %2180 = vmatpush1.bf16.msra.mxu1 %v2179_v21  ;;  %v2195_v34 = vpack.c.bf16 %v1346_v25, %v1334_v13 }
 0x212   : > { %v1341_v35 = vsub.f32 %v1339_v22, %v1340_v29  ;;  %v2193_v36 = vpack.c.bf16 %v1340_v29, %v1328_v17 }
 0x213   : > { %v1348_v38 = vand.u32 4294901760, %v1347_v33 }
 0x214   : > { %1309 = vmatmul.mubr.f32.vlgmr.msra.gmra.mrb[0].mxu1 %v1308_v26  ;;  %v1342_v41 = vand.u32 4294901760, %v1341_v35 }
 0x215   : > { %1314 = vmatprep.mubr.f32.mxu1 %v2459_v10  ;;  %v2183_v42 = vpack.c.bf16 %v1348_v38, %v1336_v37  ;;  %v1879_v37 = vld [vmem:[#allocation7 + $0x3] ss:$8 sm:$0x3] }
 0x216   : > { %v2181_v43 = vpack.c.bf16 %v1342_v41, %v1330_v40 }
 0x218   : > { %1320 = vmatmul.mubr.f32.gmra.mrb[2].mxu1 %v1319_v39  ;;  %2182 = vmatprep.subr.bf16.mxu1 %v2181_v43 }
 0x219   : > { %2184 = vmatpush1.bf16.msra.mxu1 %v2183_v42  ;;  %1410 = vmatprep.mubr.f32.mxu1 %v2459_v10 }
 0x21a   : > { %2186 = vmatprep.subr.bf16.mxu1 %v2185_v32  ;;  %v1848_v32 = vld [vmem:[#allocation7 + $0x2] ss:$8 sm:$0x3] }
 0x21c   : > { %1412 = vmatmul.mubr.f32.vlgmr.msra.gmra.mrb[0].mxu1 %v2821_v2 }
 0x21d   : > { %2188 = vmatpush1.bf16.msra.mxu1 %v2187_v28  ;;  %1417 = vmatprep.mubr.f32.mxu1 %v2459_v10 }
 0x21e   : > { %2190 = vmatprep.subr.bf16.mxu1 %v2177_v23 }
 0x220   : > { %1419 = vmatmul.mubr.f32.gmra.mrb[2].mxu1 %v2826_v57 }
 0x221   : > { %1497 = vmatprep.mubr.f32.mxu1 %v2459_v10 }
 0x224   : > { %1500 = vmatmul.mubr.f32.vlgmr.msra.gmra.mrb[0].mxu1 %v2824_v54 }
 0x225   : > { %2192 = vmatpush1.bf16.msra.mxu1 %v2179_v21  ;;  %1505 = vmatprep.mubr.f32.mxu1 %v2459_v10 }
 0x226   : > { %2194 = vmatprep.subr.bf16.mxu1 %v2193_v36 }
 0x228   : > { %1508 = vmatmul.mubr.f32.gmra.mrb[2].mxu1 %v1316_v6 }
 0x229   : > { %1582 = vmatprep.mubr.f32.mxu1 %v2459_v10 }
 0x22c   : > { %1586 = vmatmul.mubr.f32.vlgmr.msra.gmra.mrb[0].mxu1 %v1306_v0 }
 0x22d   : > { %2196 = vmatpush1.bf16.msra.mxu1 %v2195_v34  ;;  %1591 = vmatprep.mubr.f32.mxu1 %v2459_v10 }
 0x22e   : > { %2198 = vmatprep.subr.bf16.mxu1 %v2177_v23 }
 0x230   : > { %1595 = vmatmul.mubr.f32.gmra.mrb[2].mxu1 %v1317_v19  ;;  %v1784_v19 = vld [vmem:[#allocation7] ss:$8 sm:$0x3] }
 0x231   : > { %1677 = vmatprep.mubr.f32.mxu1 %v2459_v10 }
 0x234   : > { %1679 = vmatmul.mubr.f32.vlgmr.msra.gmra.mrb[0].mxu1 %v2821_v2 }
 0x235   : > { %2200 = vmatpush1.bf16.msra.mxu1 %v2179_v21  ;;  %1684 = vmatprep.mubr.f32.mxu1 %v2459_v10 }
 0x238   : > { %1686 = vmatmul.mubr.f32.gmra.mrb[2].mxu1 %v2826_v57 }
 0x239   : > { %1760 = vmatprep.mubr.f32.mxu1 %v2459_v10 }
 0x23c   : > { %1762 = vmatmul.mubr.f32.vlgmr.msra.gmra.mrb[0].mxu1 %v2821_v2 }
 0x23d   : > { %1767 = vmatprep.mubr.f32.mxu1 %v2459_v10 }
 0x240   : > { %1769 = vmatmul.mubr.f32.gmra.mrb[2].mxu1 %v2826_v57 }
 0x30f   : > { %v2849_v44 = vpop.f32.mrb[0].mxu1 }
 0x310   : > { %1778 = vrot.lane.b32.xlu1 %v2849_v44, %s2451_s28  ;;  %v2853_v45 = vpop.f32.mrb[1].mxu1  ;;  %v1807_v47 = vrot.slane %v2849_v44, 1  ;;  %v1838_v2 = vrot.slane %v2849_v44, 2  ;;  %v1869_v3 = vrot.slane %v2849_v44, 3  ;;  %v1919_v52 = vrot.slane %v2849_v44, 5 }
 0x311   : > { %v1901_v46 = vcombine.high %v2849_v44, %v2853_v45  ;;  %1780 = vrot.lane.b32.xlu0 %v2853_v45, %s2451_s28  ;;  %v1808_v10 = vrot.slane %v2853_v45, 1  ;;  %v1839_v50 = vrot.slane %v2853_v45, 2  ;;  %v1870_v51 = vrot.slane %v2853_v45, 3  ;;  %s1775_s28 = sld [smem:[#allocation3]] }
 0x312   : > { %v1920_v53 = vrot.slane %v2853_v45, 5  ;;  %v1950_v54 = vrot.slane %v2849_v44, 6  ;;  %v1951_v55 = vrot.slane %v2853_v45, 6  ;;  %v1981_v56 = vrot.slane %v2849_v44, 7 }
 0x313   : > { %v1770_v48 = vpop.f32.mrb[2].mxu1  ;;  %v1982_v57 = vrot.slane %v2853_v45, 7  ;;  %v1908_v38 = vrot.slane %v1901_v46, %v2700_v27 }
 0x314   : > { %1811 = vrot.lane.b32.xlu1 %v1807_v47, %s2453_s19  ;;  %v1772_v49 = vpop.f32.mrb[3].mxu1 }
 0x315   : > { %1813 = vrot.lane.b32.xlu0 %v1808_v10, %s2453_s19  ;;  %s283_s19 = scalar_lea.vmem [#allocation9], %s2143_s22  ;;  %s2462_s22 = smov [#allocation9]  }
 0x316   : > { %s2379_s15 = sshll.u32 %s2462_s22, 4  ;;  %s2380_s15 = int_to_ptr.vmem [resolvable:$false] %s2379_s15 }
 0x317   : > { %v1776_v18 = vstv %s1775_s28  ;;  %s2381_s9 = scalar_lea.vmem %s2380_s15, 64 }
 0x318   : > { %1842 = vrot.lane.b32.xlu1 %v1838_v2, %s2454_s11  ;;  %v1777_v28 = vadd.f32 %v1776_v18, %v2655_v4 }
 0x319   : > { %1844 = vrot.lane.b32.xlu0 %v1839_v50, %s2454_s11  ;;  %v1915_v50 = vrot.slane %v1908_v38, %v2700_v27  ;;  %s2055_s11 = sshll.u32 %s283_s19, 4  ;;  %s2947_s11 = int_to_ptr.vmem [resolvable:$true] %s2055_s11 }
 0x31a   : > { %p2382_p10 = scmp.lt.s32.totalorder %s2947_s11, %s2380_s15 }
 0x31c   : > { %1873 = vrot.lane.b32.xlu1 %v1869_v3, %s2455_s12 }
 0x31d   : > { %1875 = vrot.lane.b32.xlu0 %v1870_v51, %s2455_s12  ;;  %v1900_v51 = vld [vmem:[#allocation7 + $0x4] ss:$8 sm:$0x3] }
 0x320   : > { %1923 = vrot.lane.b32.xlu1 %v1919_v52, %s2456_s20 }
 0x321   : > { %1925 = vrot.lane.b32.xlu0 %v1920_v53, %s2456_s20 }
 0x324   : > { %1954 = vrot.lane.b32.xlu1 %v1950_v54, %s2457_s16 }
 0x325   : > { %1956 = vrot.lane.b32.xlu0 %v1951_v55, %s2457_s16 }
 0x328   : > { %1985 = vrot.lane.b32.xlu1 %v1981_v56, %s2458_s17 }
 0x329   : > { %1987 = vrot.lane.b32.xlu0 %v1982_v57, %s2458_s17  ;;  %v1929_v57 = vld [vmem:[#allocation7 + $0x5] ss:$8 sm:$0x3]  ;;  %s2375_s17 = scalar_lea.vmem %s2947_s11, 32 }
 0x32a   : > { %p2376_p4 = scmp.ne.s32.totalorder %s2947_s11, %s2375_s17  ;;  %p2383_p13 = scmp.lt.s32.totalorder %s2381_s9, %s2375_s17 }
 0x32c   : > { %2012 = vrot.lane.b32.xlu1 %v1770_v48, %s2452_s30  ;;  %p2377_p6 = pnand %p2376_p4, %p2592_p12  ;;  %p2384_p3 = por %p2383_p13, %p2382_p10 }
 0x32d   : > { %2014 = vrot.lane.b32.xlu0 %v1772_v49, %s2452_s30  ;;  %s2152_s30 = sshll.u32 %s2522_s5, 5  ;;  %s2041_s5 = scalar_lea.sflag [#allocation6], %s2637_s21 }
 0x32e   : > { %s2945_s16 = scalar_lea.hbm %s2997_s6, %s2152_s30  ;;  %p2378_p8 = pneg %p2377_p6 }
 0x330   : > { %p2385_p7 = pnand %p2384_p3, %p2378_p8 }
 0x382   : > { %v1779_v58 = vpop.permute.xlu1 %1778 }
 0x383   : > { %v1781_v59 = vpop.permute.xlu0 %1780 }
 0x384   : > { %v1782_v60 = vsel %vm302_vm1, %v1779_v58, %v1781_v59  ;;  %v1783_v61 = vsel %vm302_vm1, %v1781_v59, %v1779_v58 }
 0x385   : > { %v1787_v62 = vcombine.low %v1783_v61, %v1782_v60  ;;  %v1917_v60 = vmul.f32 %v1915_v50, %v1900_v51 }
 0x386   : > { %v1812_v63 = vpop.permute.xlu1 %1811 }
 0x387   : > { %v1814_v0 = vpop.permute.xlu0 %1813  ;;  %v1794_v6 = vrot.slane %v1787_v62, %v2700_v27 }
 0x388   : > { %v1815_v1 = vsel %vm347_vm3, %v1812_v63, %v1814_v0  ;;  %v1816_v5 = vsel %vm347_vm3, %v1814_v0, %v1812_v63  ;;  %v1960_v63 = vld [vmem:[#allocation7 + $0x6] ss:$8 sm:$0x3] }
 0x389   : > { %v1820_v7 = vcombine.low %v1816_v5, %v1815_v1  ;;  %v1801_v15 = vrot.slane %v1794_v6, %v2700_v27 }
 0x38a   : > { %v1843_v9 = vpop.permute.xlu1 %1842 }
 0x38b   : > { %v1827_v11 = vrot.slane %v1820_v7, %v2700_v27  ;;  %v1845_v12 = vpop.permute.xlu0 %1844  ;;  %v1803_v29 = vmul.f32 %v1801_v15, %v1784_v19 }
 0x38c   : > { %v1846_v13 = vsel %vm390_vm4, %v1843_v9, %v1845_v12  ;;  %v1847_v14 = vsel %vm390_vm4, %v1845_v12, %v1843_v9  ;;  %v1991_v9 = vld [vmem:[#allocation7 + $0x7] ss:$8 sm:$0x3] }
 0x38d   : > { %v1851_v17 = vcombine.low %v1847_v14, %v1846_v13  ;;  %v1834_v21 = vrot.slane %v1827_v11, %v2700_v27  ;;  %v1804_v40 = vadd.f32 %v1803_v29, %v1777_v28 }
 0x38e   : > { %v1874_v20 = vpop.permute.xlu1 %1873 }
 0x38f   : > { %v1858_v22 = vrot.slane %v1851_v17, %v2700_v27  ;;  %v1876_v23 = vpop.permute.xlu0 %1875  ;;  %v1836_v34 = vmul.f32 %v1834_v21, %v1817_v24 }
 0x390   : > { %v1877_v25 = vsel %vm433_vm5, %v1874_v20, %v1876_v23  ;;  %v1878_v26 = vsel %vm433_vm5, %v1876_v23, %v1874_v20  ;;  %v2018_v20 = vld [vmem:[#allocation7 + $0x10] ss:$8 sm:$0x3] }
 0x391   : > { %v1865_v30 = vrot.slane %v1858_v22, %v2700_v27  ;;  %v1882_v31 = vcombine.low %v1878_v26, %v1877_v25  ;;  %v1837_v48 = vadd.f32 %v1836_v34, %v1804_v40 }
 0x392   : > { %v1924_v33 = vpop.permute.xlu1 %1923 }
 0x393   : > { %v1889_v35 = vrot.slane %v1882_v31, %v2700_v27  ;;  %v1926_v36 = vpop.permute.xlu0 %1925  ;;  %v1867_v41 = vmul.f32 %v1865_v30, %v1848_v32 }
 0x394   : > { %v1927_v39 = vsel %vm482_vm6, %v1924_v33, %v1926_v36  ;;  %v1928_v4 = vsel %vm482_vm6, %v1926_v36, %v1924_v33 }
 0x395   : > { %v1896_v42 = vrot.slane %v1889_v35, %v2700_v27  ;;  %v1932_v43 = vcombine.low %v1927_v39, %v1928_v4  ;;  %v1868_v46 = vadd.f32 %v1867_v41, %v1837_v48 }
 0x396   : > { %v1955_v47 = vpop.permute.xlu1 %1954 }
 0x397   : > { %v1898_v10 = vmul.f32 %v1896_v42, %v1879_v37  ;;  %v1939_v49 = vrot.slane %v1932_v43, %v2700_v27  ;;  %v1957_v2 = vpop.permute.xlu0 %1956 }
 0x398   : > { %v1958_v44 = vsel %vm525_vm7, %v1955_v47, %v1957_v2  ;;  %v1959_v45 = vsel %vm525_vm7, %v1957_v2, %v1955_v47 }
 0x399   : > { %v1963_v3 = vcombine.low %v1958_v44, %v1959_v45  ;;  %v1899_v53 = vadd.f32 %v1898_v10, %v1868_v46  ;;  %v1946_v54 = vrot.slane %v1939_v49, %v2700_v27 }
 0x39a   : > { %v1986_v52 = vpop.permute.xlu1 %1985 }
 0x39b   : > { %v1970_v55 = vrot.slane %v1963_v3, %v2700_v27  ;;  %v1988_v56 = vpop.permute.xlu0 %1987  ;;  %v1918_v1 = vadd.f32 %v1917_v60, %v1899_v53  ;;  %v1948_v5 = vmul.f32 %v1946_v54, %v1929_v57 }
 0x39c   : > { %v1989_v58 = vsel %vm568_vm8, %v1986_v52, %v1988_v56  ;;  %v1990_v59 = vsel %vm568_vm8, %v1988_v56, %v1986_v52 }
 0x39d   : > { %v1977_v61 = vrot.slane %v1970_v55, %v2700_v27  ;;  %v1994_v62 = vcombine.low %v1989_v58, %v1990_v59  ;;  %v1949_v17 = vadd.f32 %v1948_v5, %v1918_v1 }
 0x39e   : > { %v2013_v0 = vpop.permute.xlu1 %2012 }
 0x39f   : > { %v2001_v6 = vrot.slane %v1994_v62, %v2700_v27  ;;  %v2015_v7 = vpop.permute.xlu0 %2014  ;;  %v1979_v13 = vmul.f32 %v1977_v61, %v1960_v63 }
 0x3a0   : > { %v2016_v11 = vsel %vm611_vm2, %v2013_v0, %v2015_v7  ;;  %v2017_v12 = vsel %vm611_vm2, %v2015_v7, %v2013_v0 }
 0x3a1   : > { %v2008_v14 = vrot.slane %v2001_v6, %v2700_v27  ;;  %v2021_v15 = vcombine.low %v2016_v11, %v2017_v12  ;;  %v1980_v21 = vadd.f32 %v1979_v13, %v1949_v17 }
 0x3a3   : > { %v2010_v18 = vmul.f32 %v2008_v14, %v1991_v9  ;;  %v2028_v19 = vrot.slane %v2021_v15, %v2700_v27 }
 0x3a5   : > { %v2035_v22 = vrot.slane %v2028_v19, %v2700_v27  ;;  %v2011_v16 = vadd.f32 %v2010_v18, %v1980_v21 }
 0x3a7   : > { %v2037_v23 = vmul.f32 %v2035_v22, %v2018_v20 }
 0x3a9   : > { %v2038_v24 = vadd.f32 %v2037_v23, %v2011_v16 }
 0x3ab   : > { %2039 = vst.msk [vmem:[%s283_s19] sm:$0x3] %vm2660_vm0, %v2038_v24 }
 0x3ac   : > { %2388 = shalt.err (!%p2385_p7)
}
 0x3ad   : > { %s2389_s21 = scalar_lea.hbm %s2945_s16, 32  ;;  %s2393_s27 = scalar_lea.hbm %s2997_s6, 64 }
 0x3ae   : > { %p2390_p9 = scmp.ne.s32.totalorder %s2945_s16, %s2389_s21  ;;  %p2394_p0 = scmp.lt.u32.totalorder %s2945_s16, %s2997_s6 }
 0x3af   : > { %p2395_p11 = scmp.lt.u32.totalorder %s2393_s27, %s2389_s21  ;;  %p2397_p4 = scmp.lt.u32.totalorder %s2389_s21, %s2945_s16 }
 0x3b0   : > { %p2391_p2 = pnand %p2390_p9, %p2592_p12 }
 0x3b1   : > { %p2396_p1 = por %p2395_p11, %p2394_p0 }
 0x3b2   : > { %p2392_p5 = pneg %p2391_p2 }
 0x3b3   : > { %p2398_p6 = por %p2397_p4, %p2396_p1 }
 0x3b5   : > { %p2399_p8 = pnand %p2398_p6, %p2392_p5 }
 0x3b7   : > { %2402 = shalt.err (!%p2399_p8)
}
 0x3b8   : > { %2251 = dma.vmem_to_hbm [thread:$0]  (%p2592_p12), %s2947_s11, 32, %s2945_s16, %s2041_s5  }
 0x3b9 PF: > { %s2067_s30 = sand.u32 1, %s2433_s23   ;;  %p3014_p10 = scmp.ne.s32.totalorder %s3002_s29, 0 }
 0x3ba   : > { %p3015_p13 = scmp.ge.s32.totalorder %s2445_s26, 2  ;;  %s2068_s19 = scalar_lea.sflag [#allocation6], %s2067_s30 }
 0x3bc   : > { %p2262_p3 = pnand %p3015_p13, %p3014_p10 }
 0x3be   : > { %2428 = dma.done.wait (!%p2262_p3), %s2068_s19, 32  }
 0x3bf   : > { %2430 = vsyncadd (!%p2262_p3), %s2068_s19, 4294967264  ;;  %p21_p7 = scmp.ge.s32.totalorder %s2557_s10, 4   ;;  %s3016_s23 = smov %s2437_s24 }
 0x3c0   : > { %s3017_s24 = smov %s2441_s25  ;;  %s3018_s25 = smov %s2588_s13 }
 0x3c1   : > { %s3019_s26 = smov %s2557_s10  ;;  %23 = sbr.rel (!%p21_p7) target bundleno = 8 (0x8), region = 109 }
 0x3c8   :  { %2073 = vsyncpa [#allocation5], 1 }
 0x3c9   :  { %2075 = vsyncpa [#allocation5 + $0x1], 1 }
 0x3ca   :  { %2076 = vsyncpa [#allocation8], 1 }
 0x3cb   :  { %2077 = vsyncpa [#allocation6], 1 }
 0x3cc   :  { %2079 = vsyncpa [#allocation6 + $0x1], 1 }

</bundles_post_ra>
